<compile_context>
chip_gen: v7x
topology: tpu7x:2x2x1
jax: 0.10.0
libtpu: 0.0.40
codegen_flags: <defaults>
</compile_context>

<pallas_src>
import math

import jax
import jax.numpy as jnp
import numpy as np
from jax import lax
from jax.experimental import pallas as pl
from jax.experimental.pallas import tpu as pltpu


def _layernorm(y, gamma, beta, eps=1e-5):
    mu = jnp.mean(y, axis=-1, keepdims=True)
    var = jnp.mean((y - mu) ** 2, axis=-1, keepdims=True)
    return (y - mu) * lax.rsqrt(var + eps) * gamma + beta


def encoder_layer_kernel(
    lens_ref,                                   # SMEM (B,) int32  (scalar prefetch)
    xq_ref, xkv_ref,                            # (1,tq,D) / (1,S,D) f32
    wq_ref, bq_ref, wk_ref, bk_ref, wv_ref, bv_ref,   # per-head tiles
    wo_ref, bo_ref,
    w1_ref, b1_ref, w2_ref, b2_ref,
    g1_ref, be1_ref, g2_ref, be2_ref,
    out_ref,                                    # (1,tq,D) f32
    acc_ref,                                    # VMEM (tq,D) f32 scratch
):
    b = pl.program_id(0)
    h = pl.program_id(2)
    n_heads = pl.num_programs(2)

    xq = xq_ref[0]                               # (tq, D) f32 (residual stream)
    xq_b = xq.astype(jnp.bfloat16)
    xkv_b = xkv_ref[0].astype(jnp.bfloat16)      # (S, D) bf16

    head_dim = wq_ref.shape[-1]
    scale = 1.0 / math.sqrt(head_dim)

    # ---- per-head projections (lane-dense (D, hd) weight tiles via BlockSpec)
    q = jnp.dot(xq_b, wq_ref[0], preferred_element_type=jnp.float32) + bq_ref[0]
    k = jnp.dot(xkv_b, wk_ref[0], preferred_element_type=jnp.float32) + bk_ref[0]
    v = jnp.dot(xkv_b, wv_ref[0], preferred_element_type=jnp.float32) + bv_ref[0]

    # ---- scores: contract last dims of Q and K (no explicit transpose)
    qb = (q * scale).astype(jnp.bfloat16)
    kb = k.astype(jnp.bfloat16)
    scores = lax.dot_general(qb, kb, (((1,), (1,)), ((), ())),
                             preferred_element_type=jnp.float32)   # (tq, S)

    # ---- key-padding mask generated in-kernel from prefetched lengths
    key_ok = lax.broadcasted_iota(jnp.int32, scores.shape, 1) < lens_ref[b]
    scores = jnp.where(key_ok, scores, -1e9)

    # ---- softmax (f32, max-stabilised, approx reciprocal on the EUP)
    scores = scores - jnp.max(scores, axis=-1, keepdims=True)
    p = jnp.exp(scores)
    p = p * pl.reciprocal(jnp.sum(p, axis=-1, keepdims=True), approx=True)

    ctx = jnp.dot(p.astype(jnp.bfloat16), v.astype(jnp.bfloat16),
                  preferred_element_type=jnp.float32)               # (tq, hd)

    # this head's contribution to the output projection, accumulated in f32
    partial = jnp.dot(ctx.astype(jnp.bfloat16), wo_ref[0],
                      preferred_element_type=jnp.float32)           # (tq, D)

    @pl.when(h == 0)
    def _():
        acc_ref[...] = jnp.zeros_like(acc_ref)

    acc_ref[...] += partial

    # ---- finalize at the last head: bias, LN1, FFN, LN2 (dropout = identity)
    @pl.when(h == n_heads - 1)
    def _():
        attn_out = acc_ref[...] + bo_ref[...]
        y = _layernorm(xq + attn_out, g1_ref[...], be1_ref[...])

        h1 = jnp.dot(y.astype(jnp.bfloat16), w1_ref[...],
                     preferred_element_type=jnp.float32) + b1_ref[...]
        h1 = jnp.maximum(h1, 0.0)
        ff = jnp.dot(h1.astype(jnp.bfloat16), w2_ref[...],
                     preferred_element_type=jnp.float32) + b2_ref[...]

        out_ref[0] = _layernorm(y + ff, g2_ref[...], be2_ref[...])


def encoder_layer(x, valid_lens, params, num_heads, *, q_tile=256):
    """x: (B, S, D) f32; valid_lens: (B,) int32 (key-padding lengths)."""
    B, S, D = x.shape
    d_ff = params["w1"].shape[1]
    assert D % num_heads == 0
    hd = D // num_heads

    tq = q_tile if S % q_tile == 0 else S
    nq = S // tq

    bf16 = jnp.bfloat16
    # Pre-split weights head-major on the host (free); cast matmul weights to bf16.
    wq_h = params["wq"].reshape(D, num_heads, hd).transpose(1, 0, 2).astype(bf16)
    wk_h = params["wk"].reshape(D, num_heads, hd).transpose(1, 0, 2).astype(bf16)
    wv_h = params["wv"].reshape(D, num_heads, hd).transpose(1, 0, 2).astype(bf16)
    bq_h = params["bq"].reshape(1, num_heads, hd).transpose(1, 0, 2)   # (H,1,hd) f32
    bk_h = params["bk"].reshape(1, num_heads, hd).transpose(1, 0, 2)
    bv_h = params["bv"].reshape(1, num_heads, hd).transpose(1, 0, 2)
    wo_h = params["wo"].reshape(num_heads, hd, D).astype(bf16)         # (H,hd,D)
    w1 = params["w1"].astype(bf16)
    w2 = params["w2"].astype(bf16)

    def const2(shape):
        return pl.BlockSpec(shape, lambda b, qi, h, lens: (0, 0))

    def head3(shape):
        return pl.BlockSpec(shape, lambda b, qi, h, lens: (h, 0, 0))

    in_specs = [
        pl.BlockSpec((1, tq, D), lambda b, qi, h, lens: (b, qi, 0)),   # x (query tile)
        pl.BlockSpec((1, S, D),  lambda b, qi, h, lens: (b, 0, 0)),    # x (full seq, K/V)
        head3((1, D, hd)), head3((1, 1, hd)),                          # wq, bq
        head3((1, D, hd)), head3((1, 1, hd)),                          # wk, bk
        head3((1, D, hd)), head3((1, 1, hd)),                          # wv, bv
        head3((1, hd, D)), const2((1, D)),                             # wo, bo
        const2((D, d_ff)), const2((1, d_ff)),                          # w1, b1
        const2((d_ff, D)), const2((1, D)),                             # w2, b2
        const2((1, D)), const2((1, D)),                                # ln1 gamma/beta
        const2((1, D)), const2((1, D)),                                # ln2 gamma/beta
    ]

    flops = int(B * nq * (4 * tq * D * D          # Q proj + output proj
                          + 4 * S * D * D          # K, V proj (per q-tile)
                          + 4 * tq * S * D         # scores + PV
                          + 4 * tq * D * d_ff))    # FFN
    transcendentals = int(B * nq * num_heads * tq * S)
    bytes_accessed = int(4 * B * S * D * 3                       # x (x2 streams) + out
                         + 2 * (4 * D * D + 2 * D * d_ff)        # bf16 weights
                         + 4 * (7 * D + d_ff + B))               # biases/LN/lens

    return pl.pallas_call(
        encoder_layer_kernel,
        out_shape=jax.ShapeDtypeStruct((B, S, D), jnp.float32),
        grid_spec=pltpu.PrefetchScalarGridSpec(
            num_scalar_prefetch=1,
            grid=(B, nq, num_heads),                 # head axis = innermost reduction
            in_specs=in_specs,
            out_specs=pl.BlockSpec((1, tq, D), lambda b, qi, h, lens: (b, qi, 0)),
            scratch_shapes=[pltpu.VMEM((tq, D), jnp.float32)],
        ),
        compiler_params=pltpu.CompilerParams(
            dimension_semantics=("parallel", "parallel", "arbitrary")),
        cost_estimate=pl.CostEstimate(
            flops=flops, transcendentals=transcendentals,
            bytes_accessed=bytes_accessed),
    )(
        valid_lens.astype(jnp.int32),
        x, x,
        wq_h, bq_h, wk_h, bk_h, wv_h, bv_h, wo_h, params["bo"],
        w1, params["b1"], w2, params["b2"],
        params["g1"], params["be1"], params["g2"], params["be2"],
    )


# ---------------------------- pure-JAX reference ----------------------------
def encoder_layer_ref(x, src_mask, params, num_heads):
    B, S, D = x.shape
    hd = D // num_heads

    def proj(v, w, b):
        return v @ w + b

    q = proj(x, params["wq"], params["bq"]).reshape(B, S, num_heads, hd).transpose(0, 2, 1, 3)
    k = proj(x, params["wk"], params["bk"]).reshape(B, S, num_heads, hd).transpose(0, 2, 1, 3)
    v = proj(x, params["wv"], params["bv"]).reshape(B, S, num_heads, hd).transpose(0, 2, 1, 3)
    scores = jnp.einsum("bhqd,bhkd->bhqk", q, k) / math.sqrt(hd)
    scores = jnp.where(src_mask[:, None, :, :] > 0, scores, -1e9)
    p = jax.nn.softmax(scores, axis=-1)
    attn = jnp.einsum("bhqk,bhkd->bhqd", p, v).transpose(0, 2, 1, 3).reshape(B, S, D)
    attn = attn @ params["wo"] + params["bo"]

    def ln(y, g, b):
        mu = y.mean(-1, keepdims=True)
        var = ((y - mu) ** 2).mean(-1, keepdims=True)
        return (y - mu) / jnp.sqrt(var + 1e-5) * g + b

    y = ln(x + attn, params["g1"], params["be1"])
    ff = jnp.maximum(y @ params["w1"] + params["b1"], 0.0) @ params["w2"] + params["b2"]
    return ln(y + ff, params["g2"], params["be2"])


if __name__ == "__main__":
    B, S, D, H, FF = 2, 8, 32, 4, 64

    key = jax.random.PRNGKey(0)
    keys = jax.random.split(key, 16)

    def w(k, shape, scale=0.05):
        return (scale * jax.random.normal(k, shape)).astype(jnp.float32)

    params = {
        "wq": w(keys[0], (D, D)),  "bq": w(keys[1], (1, D)),
        "wk": w(keys[2], (D, D)),  "bk": w(keys[3], (1, D)),
        "wv": w(keys[4], (D, D)),  "bv": w(keys[5], (1, D)),
        "wo": w(keys[6], (D, D)),  "bo": w(keys[7], (1, D)),
        "w1": w(keys[8], (D, FF)), "b1": w(keys[9], (1, FF)),
        "w2": w(keys[10], (FF, D)), "b2": w(keys[11], (1, D)),
        "g1": jnp.ones((1, D), jnp.float32),  "be1": jnp.zeros((1, D), jnp.float32),
        "g2": jnp.ones((1, D), jnp.float32),  "be2": jnp.zeros((1, D), jnp.float32),
    }

    x = jax.random.normal(keys[12], (B, S, D), dtype=jnp.float32)

    # padding-style mask: batch 0 attends to all 8 keys, batch 1 only to the first 6
    valid_lens = jnp.array([8, 6], dtype=jnp.int32)
    key_ok = (jnp.arange(S)[None, :] < valid_lens[:, None]).astype(jnp.float32)   # (B, S)
    src_mask = jnp.broadcast_to(key_ok[:, None, :], (B, S, S))                    # (B, S, S)

    out = encoder_layer(x, valid_lens, params, num_heads=H)
    out = jax.block_until_ready(out)

    ref = encoder_layer_ref(x, src_mask, params, num_heads=H)
    # bf16 MXU inputs (f32 accumulation) + approx reciprocal => looser tolerance.
    np.testing.assert_allclose(np.asarray(out), np.asarray(ref), rtol=2e-2, atol=2e-2)

    print("KERNEL_OK")
</pallas_src>

<mosaic_0001>
module attributes {stable_mosaic.version = 11 : i64} {
  func.func @encoder_layer_kernel(%arg0: i32, %arg1: i32, %arg2: i32, %arg3: memref<2xi32, #tpu.memory_space<smem>>, %arg4: memref<1x8x32xf32, #tpu.memory_space<vmem>>, %arg5: memref<1x8x32xf32, #tpu.memory_space<vmem>>, %arg6: memref<1x32x8xbf16, #tpu.memory_space<vmem>>, %arg7: memref<1x1x8xf32, #tpu.memory_space<vmem>>, %arg8: memref<1x32x8xbf16, #tpu.memory_space<vmem>>, %arg9: memref<1x1x8xf32, #tpu.memory_space<vmem>>, %arg10: memref<1x32x8xbf16, #tpu.memory_space<vmem>>, %arg11: memref<1x1x8xf32, #tpu.memory_space<vmem>>, %arg12: memref<1x8x32xbf16, #tpu.memory_space<vmem>>, %arg13: memref<1x32xf32, #tpu.memory_space<vmem>>, %arg14: memref<32x64xbf16, #tpu.memory_space<vmem>>, %arg15: memref<1x64xf32, #tpu.memory_space<vmem>>, %arg16: memref<64x32xbf16, #tpu.memory_space<vmem>>, %arg17: memref<1x32xf32, #tpu.memory_space<vmem>>, %arg18: memref<1x32xf32, #tpu.memory_space<vmem>>, %arg19: memref<1x32xf32, #tpu.memory_space<vmem>>, %arg20: memref<1x32xf32, #tpu.memory_space<vmem>>, %arg21: memref<1x32xf32, #tpu.memory_space<vmem>>, %arg22: memref<1x8x32xf32, #tpu.memory_space<vmem>>, %arg23: memref<8x32xf32, #tpu.memory_space<vmem>>) attributes {dimension_semantics = [#tpu.dimension_semantics<parallel>, #tpu.dimension_semantics<parallel>, #tpu.dimension_semantics<arbitrary>], iteration_bounds = array<i64: 2, 1, 4>, scalar_prefetch = 1 : i64, scratch_operands = 1 : i64, tpu.core_type = #tpu.core_type<tc>, window_params = [{transform_indices = @transform_0, window_bounds = array<i64: 1, 8, 32>}, {transform_indices = @transform_1, window_bounds = array<i64: 1, 8, 32>}, {transform_indices = @transform_2, window_bounds = array<i64: 1, 32, 8>}, {transform_indices = @transform_3, window_bounds = array<i64: 1, 1, 8>}, {transform_indices = @transform_4, window_bounds = array<i64: 1, 32, 8>}, {transform_indices = @transform_5, window_bounds = array<i64: 1, 1, 8>}, {transform_indices = @transform_6, window_bounds = array<i64: 1, 32, 8>}, {transform_indices = @transform_7, window_bounds = array<i64: 1, 1, 8>}, {transform_indices = @transform_8, window_bounds = array<i64: 1, 8, 32>}, {pipeline_mode = #tpu.pipeline_mode<synchronous>, transform_indices = @transform_9, window_bounds = array<i64: 1, 32>}, {pipeline_mode = #tpu.pipeline_mode<synchronous>, transform_indices = @transform_10, window_bounds = array<i64: 32, 64>}, {pipeline_mode = #tpu.pipeline_mode<synchronous>, transform_indices = @transform_11, window_bounds = array<i64: 1, 64>}, {pipeline_mode = #tpu.pipeline_mode<synchronous>, transform_indices = @transform_12, window_bounds = array<i64: 64, 32>}, {pipeline_mode = #tpu.pipeline_mode<synchronous>, transform_indices = @transform_13, window_bounds = array<i64: 1, 32>}, {pipeline_mode = #tpu.pipeline_mode<synchronous>, transform_indices = @transform_14, window_bounds = array<i64: 1, 32>}, {pipeline_mode = #tpu.pipeline_mode<synchronous>, transform_indices = @transform_15, window_bounds = array<i64: 1, 32>}, {pipeline_mode = #tpu.pipeline_mode<synchronous>, transform_indices = @transform_16, window_bounds = array<i64: 1, 32>}, {pipeline_mode = #tpu.pipeline_mode<synchronous>, transform_indices = @transform_17, window_bounds = array<i64: 1, 32>}, {transform_indices = @transform_18, window_bounds = array<i64: 1, 8, 32>}]} {
    %c0 = arith.constant 0 : index
    %c0_0 = arith.constant 0 : index
    %c0_1 = arith.constant 0 : index
    %0 = vector.load %arg4[%c0, %c0_0, %c0_1] : memref<1x8x32xf32, #tpu.memory_space<vmem>>, vector<1x8x32xf32>
    %1 = vector.shape_cast %0 : vector<1x8x32xf32> to vector<8x32xf32>
    %2 = arith.truncf %1 : vector<8x32xf32> to vector<8x32xbf16>
    %c0_2 = arith.constant 0 : index
    %c0_3 = arith.constant 0 : index
    %c0_4 = arith.constant 0 : index
    %3 = vector.load %arg5[%c0_2, %c0_3, %c0_4] : memref<1x8x32xf32, #tpu.memory_space<vmem>>, vector<1x8x32xf32>
    %4 = vector.shape_cast %3 : vector<1x8x32xf32> to vector<8x32xf32>
    %5 = arith.truncf %4 : vector<8x32xf32> to vector<8x32xbf16>
    %c0_5 = arith.constant 0 : index
    %c0_6 = arith.constant 0 : index
    %c0_7 = arith.constant 0 : index
    %6 = vector.load %arg6[%c0_5, %c0_6, %c0_7] : memref<1x32x8xbf16, #tpu.memory_space<vmem>>, vector<1x32x8xbf16>
    %7 = vector.shape_cast %6 : vector<1x32x8xbf16> to vector<32x8xbf16>
    %cst = arith.constant dense<0.000000e+00> : vector<8x8xf32>
    %8 = tpu.matmul %2, %7, %cst {dimension_numbers = #tpu.dot_dimension_numbers<[1], [0], [0], [1], [0, 0, 1, 1], [], []>} : vector<8x32xbf16>, vector<32x8xbf16>, vector<8x8xf32> -> vector<8x8xf32>
    %c0_8 = arith.constant 0 : index
    %c0_9 = arith.constant 0 : index
    %c0_10 = arith.constant 0 : index
    %9 = vector.load %arg7[%c0_8, %c0_9, %c0_10] : memref<1x1x8xf32, #tpu.memory_space<vmem>>, vector<1x1x8xf32>
    %10 = vector.shape_cast %9 : vector<1x1x8xf32> to vector<1x8xf32>
    %11 = vector.broadcast %10 : vector<1x8xf32> to vector<8x8xf32>
    %12 = arith.addf %8, %11 : vector<8x8xf32>
    %c0_11 = arith.constant 0 : index
    %c0_12 = arith.constant 0 : index
    %c0_13 = arith.constant 0 : index
    %13 = vector.load %arg8[%c0_11, %c0_12, %c0_13] : memref<1x32x8xbf16, #tpu.memory_space<vmem>>, vector<1x32x8xbf16>
    %14 = vector.shape_cast %13 : vector<1x32x8xbf16> to vector<32x8xbf16>
    %cst_14 = arith.constant dense<0.000000e+00> : vector<8x8xf32>
    %15 = tpu.matmul %5, %14, %cst_14 {dimension_numbers = #tpu.dot_dimension_numbers<[1], [0], [0], [1], [0, 0, 1, 1], [], []>} : vector<8x32xbf16>, vector<32x8xbf16>, vector<8x8xf32> -> vector<8x8xf32>
    %c0_15 = arith.constant 0 : index
    %c0_16 = arith.constant 0 : index
    %c0_17 = arith.constant 0 : index
    %16 = vector.load %arg9[%c0_15, %c0_16, %c0_17] : memref<1x1x8xf32, #tpu.memory_space<vmem>>, vector<1x1x8xf32>
    %17 = vector.shape_cast %16 : vector<1x1x8xf32> to vector<1x8xf32>
    %18 = vector.broadcast %17 : vector<1x8xf32> to vector<8x8xf32>
    %19 = arith.addf %15, %18 : vector<8x8xf32>
    %c0_18 = arith.constant 0 : index
    %c0_19 = arith.constant 0 : index
    %c0_20 = arith.constant 0 : index
    %20 = vector.load %arg10[%c0_18, %c0_19, %c0_20] : memref<1x32x8xbf16, #tpu.memory_space<vmem>>, vector<1x32x8xbf16>
    %21 = vector.shape_cast %20 : vector<1x32x8xbf16> to vector<32x8xbf16>
    %cst_21 = arith.constant dense<0.000000e+00> : vector<8x8xf32>
    %22 = tpu.matmul %5, %21, %cst_21 {dimension_numbers = #tpu.dot_dimension_numbers<[1], [0], [0], [1], [0, 0, 1, 1], [], []>} : vector<8x32xbf16>, vector<32x8xbf16>, vector<8x8xf32> -> vector<8x8xf32>
    %c0_22 = arith.constant 0 : index
    %c0_23 = arith.constant 0 : index
    %c0_24 = arith.constant 0 : index
    %23 = vector.load %arg11[%c0_22, %c0_23, %c0_24] : memref<1x1x8xf32, #tpu.memory_space<vmem>>, vector<1x1x8xf32>
    %24 = vector.shape_cast %23 : vector<1x1x8xf32> to vector<1x8xf32>
    %25 = vector.broadcast %24 : vector<1x8xf32> to vector<8x8xf32>
    %26 = arith.addf %22, %25 : vector<8x8xf32>
    %cst_25 = arith.constant 0.353553385 : f32
    %27 = vector.broadcast %cst_25 : f32 to vector<8x8xf32>
    %28 = arith.mulf %12, %27 : vector<8x8xf32>
    %29 = arith.truncf %28 : vector<8x8xf32> to vector<8x8xbf16>
    %30 = arith.truncf %19 : vector<8x8xf32> to vector<8x8xbf16>
    %cst_26 = arith.constant dense<0.000000e+00> : vector<8x8xf32>
    %31 = tpu.matmul %29, %30, %cst_26 {dimension_numbers = #tpu.dot_dimension_numbers<[1], [1], [0], [0], [0, 0, 1, 0], [], []>} : vector<8x8xbf16>, vector<8x8xbf16>, vector<8x8xf32> -> vector<8x8xf32>
    %32 = tpu.iota {dimensions = array<i32: 1>} : vector<8x8xi32>
    %33 = arith.index_cast %arg0 : i32 to index
    %34 = memref.load %arg3[%33] : memref<2xi32, #tpu.memory_space<smem>>
    %35 = vector.broadcast %34 : i32 to vector<8x8xi32>
    %36 = arith.cmpi slt, %32, %35 : vector<8x8xi32>
    %cst_27 = arith.constant -1.000000e+09 : f32
    %37 = vector.broadcast %cst_27 : f32 to vector<8x8xf32>
    %38 = arith.select %36, %31, %37 : vector<8x8xi1>, vector<8x8xf32>
    %cst_28 = arith.constant dense<0xFF800000> : vector<8xf32>
    %39 = vector.multi_reduction <maximumf>, %38, %cst_28 [1] : vector<8x8xf32> to vector<8xf32>
    %40 = vector.shape_cast %39 : vector<8xf32> to vector<8x1xf32>
    %41 = vector.broadcast %40 : vector<8x1xf32> to vector<8x8xf32>
    %42 = arith.subf %38, %41 : vector<8x8xf32>
    %43 = math.exp %42 : vector<8x8xf32>
    %cst_29 = arith.constant dense<0.000000e+00> : vector<8xf32>
    %44 = vector.multi_reduction <add>, %43, %cst_29 [1] : vector<8x8xf32> to vector<8xf32>
    %45 = vector.shape_cast %44 : vector<8xf32> to vector<8x1xf32>
    %46 = tpu.reciprocal %45 {approx = true} : vector<8x1xf32> -> vector<8x1xf32>
    %47 = vector.broadcast %46 : vector<8x1xf32> to vector<8x8xf32>
    %48 = arith.mulf %43, %47 : vector<8x8xf32>
    %49 = arith.truncf %48 : vector<8x8xf32> to vector<8x8xbf16>
    %50 = arith.truncf %26 : vector<8x8xf32> to vector<8x8xbf16>
    %cst_30 = arith.constant dense<0.000000e+00> : vector<8x8xf32>
    %51 = tpu.matmul %49, %50, %cst_30 {dimension_numbers = #tpu.dot_dimension_numbers<[1], [0], [0], [1], [0, 0, 1, 1], [], []>} : vector<8x8xbf16>, vector<8x8xbf16>, vector<8x8xf32> -> vector<8x8xf32>
    %52 = arith.truncf %51 : vector<8x8xf32> to vector<8x8xbf16>
    %c0_31 = arith.constant 0 : index
    %c0_32 = arith.constant 0 : index
    %c0_33 = arith.constant 0 : index
    %53 = vector.load %arg12[%c0_31, %c0_32, %c0_33] : memref<1x8x32xbf16, #tpu.memory_space<vmem>>, vector<1x8x32xbf16>
    %54 = vector.shape_cast %53 : vector<1x8x32xbf16> to vector<8x32xbf16>
    %cst_34 = arith.constant dense<0.000000e+00> : vector<8x32xf32>
    %55 = tpu.matmul %52, %54, %cst_34 {dimension_numbers = #tpu.dot_dimension_numbers<[1], [0], [0], [1], [0, 0, 1, 1], [], []>} : vector<8x8xbf16>, vector<8x32xbf16>, vector<8x32xf32> -> vector<8x32xf32>
    %c0_i32 = arith.constant 0 : i32
    %56 = arith.cmpi eq, %arg2, %c0_i32 : i32
    %57 = arith.extui %56 : i1 to i32
    %c0_i32_35 = arith.constant 0 : i32
    %58 = arith.cmpi ne, %57, %c0_i32_35 : i32
    scf.if %58 {
      %cst_41 = arith.constant 0.000000e+00 : f32
      %65 = vector.broadcast %cst_41 : f32 to vector<8x32xf32>
      %c0_42 = arith.constant 0 : index
      %c0_43 = arith.constant 0 : index
      %66 = vector.load %arg23[%c0_42, %c0_43] : memref<8x32xf32, #tpu.memory_space<vmem>>, vector<8x32xf32>
      tpu.vector_store %arg23[%c0_42, %c0_43], %65 {strides = array<i32>} : memref<8x32xf32, #tpu.memory_space<vmem>>, vector<8x32xf32>,
    } else {
    }
    %c0_36 = arith.constant 0 : index
    %c0_37 = arith.constant 0 : index
    %59 = vector.load %arg23[%c0_36, %c0_37] : memref<8x32xf32, #tpu.memory_space<vmem>>, vector<8x32xf32>
    %60 = arith.addf %59, %55 : vector<8x32xf32>
    %c0_38 = arith.constant 0 : index
    %c0_39 = arith.constant 0 : index
    %61 = vector.load %arg23[%c0_38, %c0_39] : memref<8x32xf32, #tpu.memory_space<vmem>>, vector<8x32xf32>
    tpu.vector_store %arg23[%c0_38, %c0_39], %60 {strides = array<i32>} : memref<8x32xf32, #tpu.memory_space<vmem>>, vector<8x32xf32>,
    %c3_i32 = arith.constant 3 : i32
    %62 = arith.cmpi eq, %arg2, %c3_i32 : i32
    %63 = arith.extui %62 : i1 to i32
    %c0_i32_40 = arith.constant 0 : i32
    %64 = arith.cmpi ne, %63, %c0_i32_40 : i32
    scf.if %64 {
      %c0_41 = arith.constant 0 : index
      %c0_42 = arith.constant 0 : index
      %65 = vector.load %arg23[%c0_41, %c0_42] : memref<8x32xf32, #tpu.memory_space<vmem>>, vector<8x32xf32>
      %c0_43 = arith.constant 0 : index
      %c0_44 = arith.constant 0 : index
      %66 = vector.load %arg13[%c0_43, %c0_44] : memref<1x32xf32, #tpu.memory_space<vmem>>, vector<1x32xf32>
      %67 = vector.broadcast %66 : vector<1x32xf32> to vector<8x32xf32>
      %68 = arith.addf %65, %67 : vector<8x32xf32>
      %69 = arith.addf %1, %68 : vector<8x32xf32>
      %c0_45 = arith.constant 0 : index
      %c0_46 = arith.constant 0 : index
      %70 = vector.load %arg18[%c0_45, %c0_46] : memref<1x32xf32, #tpu.memory_space<vmem>>, vector<1x32xf32>
      %c0_47 = arith.constant 0 : index
      %c0_48 = arith.constant 0 : index
      %71 = vector.load %arg19[%c0_47, %c0_48] : memref<1x32xf32, #tpu.memory_space<vmem>>, vector<1x32xf32>
      %cst_49 = arith.constant dense<0.000000e+00> : vector<8xf32>
      %72 = vector.multi_reduction <add>, %69, %cst_49 [1] : vector<8x32xf32> to vector<8xf32>
      %73 = vector.shape_cast %72 : vector<8xf32> to vector<8x1xf32>
      %cst_50 = arith.constant 3.200000e+01 : f32
      %74 = vector.broadcast %cst_50 : f32 to vector<8x1xf32>
      %75 = arith.divf %73, %74 : vector<8x1xf32>
      %76 = vector.broadcast %75 : vector<8x1xf32> to vector<8x32xf32>
      %77 = arith.subf %69, %76 : vector<8x32xf32>
      %78 = arith.mulf %77, %77 : vector<8x32xf32>
      %cst_51 = arith.constant dense<0.000000e+00> : vector<8xf32>
      %79 = vector.multi_reduction <add>, %78, %cst_51 [1] : vector<8x32xf32> to vector<8xf32>
      %80 = vector.shape_cast %79 : vector<8xf32> to vector<8x1xf32>
      %cst_52 = arith.constant 3.200000e+01 : f32
      %81 = vector.broadcast %cst_52 : f32 to vector<8x1xf32>
      %82 = arith.divf %80, %81 : vector<8x1xf32>
      %83 = vector.broadcast %75 : vector<8x1xf32> to vector<8x32xf32>
      %84 = arith.subf %69, %83 : vector<8x32xf32>
      %cst_53 = arith.constant 9.99999974E-6 : f32
      %85 = vector.broadcast %cst_53 : f32 to vector<8x1xf32>
      %86 = arith.addf %82, %85 : vector<8x1xf32>
      %87 = math.rsqrt %86 : vector<8x1xf32>
      %88 = vector.broadcast %87 : vector<8x1xf32> to vector<8x32xf32>
      %89 = arith.mulf %84, %88 : vector<8x32xf32>
      %90 = vector.broadcast %70 : vector<1x32xf32> to vector<8x32xf32>
      %91 = arith.mulf %89, %90 : vector<8x32xf32>
      %92 = vector.broadcast %71 : vector<1x32xf32> to vector<8x32xf32>
      %93 = arith.addf %91, %92 : vector<8x32xf32>
      %94 = arith.truncf %93 : vector<8x32xf32> to vector<8x32xbf16>
      %c0_54 = arith.constant 0 : index
      %c0_55 = arith.constant 0 : index
      %95 = vector.load %arg14[%c0_54, %c0_55] : memref<32x64xbf16, #tpu.memory_space<vmem>>, vector<32x64xbf16>
      %cst_56 = arith.constant dense<0.000000e+00> : vector<8x64xf32>
      %96 = tpu.matmul %94, %95, %cst_56 {dimension_numbers = #tpu.dot_dimension_numbers<[1], [0], [0], [1], [0, 0, 1, 1], [], []>} : vector<8x32xbf16>, vector<32x64xbf16>, vector<8x64xf32> -> vector<8x64xf32>
      %c0_57 = arith.constant 0 : index
      %c0_58 = arith.constant 0 : index
      %97 = vector.load %arg15[%c0_57, %c0_58] : memref<1x64xf32, #tpu.memory_space<vmem>>, vector<1x64xf32>
      %98 = vector.broadcast %97 : vector<1x64xf32> to vector<8x64xf32>
      %99 = arith.addf %96, %98 : vector<8x64xf32>
      %cst_59 = arith.constant 0.000000e+00 : f32
      %100 = vector.broadcast %cst_59 : f32 to vector<8x64xf32>
      %101 = arith.maximumf %99, %100 : vector<8x64xf32>
      %102 = arith.truncf %101 : vector<8x64xf32> to vector<8x64xbf16>
      %c0_60 = arith.constant 0 : index
      %c0_61 = arith.constant 0 : index
      %103 = vector.load %arg16[%c0_60, %c0_61] : memref<64x32xbf16, #tpu.memory_space<vmem>>, vector<64x32xbf16>
      %cst_62 = arith.constant dense<0.000000e+00> : vector<8x32xf32>
      %104 = tpu.matmul %102, %103, %cst_62 {dimension_numbers = #tpu.dot_dimension_numbers<[1], [0], [0], [1], [0, 0, 1, 1], [], []>} : vector<8x64xbf16>, vector<64x32xbf16>, vector<8x32xf32> -> vector<8x32xf32>
      %c0_63 = arith.constant 0 : index
      %c0_64 = arith.constant 0 : index
      %105 = vector.load %arg17[%c0_63, %c0_64] : memref<1x32xf32, #tpu.memory_space<vmem>>, vector<1x32xf32>
      %106 = vector.broadcast %105 : vector<1x32xf32> to vector<8x32xf32>
      %107 = arith.addf %104, %106 : vector<8x32xf32>
      %108 = arith.addf %93, %107 : vector<8x32xf32>
      %c0_65 = arith.constant 0 : index
      %c0_66 = arith.constant 0 : index
      %109 = vector.load %arg20[%c0_65, %c0_66] : memref<1x32xf32, #tpu.memory_space<vmem>>, vector<1x32xf32>
      %c0_67 = arith.constant 0 : index
      %c0_68 = arith.constant 0 : index
      %110 = vector.load %arg21[%c0_67, %c0_68] : memref<1x32xf32, #tpu.memory_space<vmem>>, vector<1x32xf32>
      %cst_69 = arith.constant dense<0.000000e+00> : vector<8xf32>
      %111 = vector.multi_reduction <add>, %108, %cst_69 [1] : vector<8x32xf32> to vector<8xf32>
      %112 = vector.shape_cast %111 : vector<8xf32> to vector<8x1xf32>
      %cst_70 = arith.constant 3.200000e+01 : f32
      %113 = vector.broadcast %cst_70 : f32 to vector<8x1xf32>
      %114 = arith.divf %112, %113 : vector<8x1xf32>
      %115 = vector.broadcast %114 : vector<8x1xf32> to vector<8x32xf32>
      %116 = arith.subf %108, %115 : vector<8x32xf32>
      %117 = arith.mulf %116, %116 : vector<8x32xf32>
      %cst_71 = arith.constant dense<0.000000e+00> : vector<8xf32>
      %118 = vector.multi_reduction <add>, %117, %cst_71 [1] : vector<8x32xf32> to vector<8xf32>
      %119 = vector.shape_cast %118 : vector<8xf32> to vector<8x1xf32>
      %cst_72 = arith.constant 3.200000e+01 : f32
      %120 = vector.broadcast %cst_72 : f32 to vector<8x1xf32>
      %121 = arith.divf %119, %120 : vector<8x1xf32>
      %122 = vector.broadcast %114 : vector<8x1xf32> to vector<8x32xf32>
      %123 = arith.subf %108, %122 : vector<8x32xf32>
      %cst_73 = arith.constant 9.99999974E-6 : f32
      %124 = vector.broadcast %cst_73 : f32 to vector<8x1xf32>
      %125 = arith.addf %121, %124 : vector<8x1xf32>
      %126 = math.rsqrt %125 : vector<8x1xf32>
      %127 = vector.broadcast %126 : vector<8x1xf32> to vector<8x32xf32>
      %128 = arith.mulf %123, %127 : vector<8x32xf32>
      %129 = vector.broadcast %109 : vector<1x32xf32> to vector<8x32xf32>
      %130 = arith.mulf %128, %129 : vector<8x32xf32>
      %131 = vector.broadcast %110 : vector<1x32xf32> to vector<8x32xf32>
      %132 = arith.addf %130, %131 : vector<8x32xf32>
      %c0_74 = arith.constant 0 : index
      %c0_75 = arith.constant 0 : index
      %c0_76 = arith.constant 0 : index
      %133 = vector.load %arg22[%c0_74, %c0_75, %c0_76] : memref<1x8x32xf32, #tpu.memory_space<vmem>>, vector<1x8x32xf32>
      %134 = vector.shape_cast %133 : vector<1x8x32xf32> to vector<8x32xf32>
      %135 = vector.shape_cast %132 : vector<8x32xf32> to vector<1x8x32xf32>
      tpu.vector_store %arg22[%c0_74, %c0_75, %c0_76], %135 {strides = array<i32>} : memref<1x8x32xf32, #tpu.memory_space<vmem>>, vector<1x8x32xf32>,
    } else {
    }
    return
  }
  func.func @transform_0(%arg0: i32, %arg1: i32, %arg2: i32, %arg3: memref<2xi32, #tpu.memory_space<smem>>) -> (i32, i32, i32) {
    %c0_i32 = arith.constant 0 : i32
    %c0_i32_0 = arith.constant 0 : i32
    return %arg0, %arg1, %c0_i32 : i32, i32, i32
  }
  func.func @transform_1(%arg0: i32, %arg1: i32, %arg2: i32, %arg3: memref<2xi32, #tpu.memory_space<smem>>) -> (i32, i32, i32) {
    %c0_i32 = arith.constant 0 : i32
    %c0_i32_0 = arith.constant 0 : i32
    %c0_i32_1 = arith.constant 0 : i32
    return %arg0, %c0_i32, %c0_i32_0 : i32, i32, i32
  }
  func.func @transform_2(%arg0: i32, %arg1: i32, %arg2: i32, %arg3: memref<2xi32, #tpu.memory_space<smem>>) -> (i32, i32, i32) {
    %c0_i32 = arith.constant 0 : i32
    %c0_i32_0 = arith.constant 0 : i32
    %c0_i32_1 = arith.constant 0 : i32
    return %arg2, %c0_i32, %c0_i32_0 : i32, i32, i32
  }
  func.func @transform_3(%arg0: i32, %arg1: i32, %arg2: i32, %arg3: memref<2xi32, #tpu.memory_space<smem>>) -> (i32, i32, i32) {
    %c0_i32 = arith.constant 0 : i32
    %c0_i32_0 = arith.constant 0 : i32
    %c0_i32_1 = arith.constant 0 : i32
    return %arg2, %c0_i32, %c0_i32_0 : i32, i32, i32
  }
  func.func @transform_4(%arg0: i32, %arg1: i32, %arg2: i32, %arg3: memref<2xi32, #tpu.memory_space<smem>>) -> (i32, i32, i32) {
    %c0_i32 = arith.constant 0 : i32
    %c0_i32_0 = arith.constant 0 : i32
    %c0_i32_1 = arith.constant 0 : i32
    return %arg2, %c0_i32, %c0_i32_0 : i32, i32, i32
  }
  func.func @transform_5(%arg0: i32, %arg1: i32, %arg2: i32, %arg3: memref<2xi32, #tpu.memory_space<smem>>) -> (i32, i32, i32) {
    %c0_i32 = arith.constant 0 : i32
    %c0_i32_0 = arith.constant 0 : i32
    %c0_i32_1 = arith.constant 0 : i32
    return %arg2, %c0_i32, %c0_i32_0 : i32, i32, i32
  }
  func.func @transform_6(%arg0: i32, %arg1: i32, %arg2: i32, %arg3: memref<2xi32, #tpu.memory_space<smem>>) -> (i32, i32, i32) {
    %c0_i32 = arith.constant 0 : i32
    %c0_i32_0 = arith.constant 0 : i32
    %c0_i32_1 = arith.constant 0 : i32
    return %arg2, %c0_i32, %c0_i32_0 : i32, i32, i32
  }
  func.func @transform_7(%arg0: i32, %arg1: i32, %arg2: i32, %arg3: memref<2xi32, #tpu.memory_space<smem>>) -> (i32, i32, i32) {
    %c0_i32 = arith.constant 0 : i32
    %c0_i32_0 = arith.constant 0 : i32
    %c0_i32_1 = arith.constant 0 : i32
    return %arg2, %c0_i32, %c0_i32_0 : i32, i32, i32
  }
  func.func @transform_8(%arg0: i32, %arg1: i32, %arg2: i32, %arg3: memref<2xi32, #tpu.memory_space<smem>>) -> (i32, i32, i32) {
    %c0_i32 = arith.constant 0 : i32
    %c0_i32_0 = arith.constant 0 : i32
    %c0_i32_1 = arith.constant 0 : i32
    return %arg2, %c0_i32, %c0_i32_0 : i32, i32, i32
  }
  func.func @transform_9(%arg0: i32, %arg1: i32, %arg2: i32, %arg3: memref<2xi32, #tpu.memory_space<smem>>) -> (i32, i32) {
    %c0_i32 = arith.constant 0 : i32
    %c0_i32_0 = arith.constant 0 : i32
    %c0_i32_1 = arith.constant 0 : i32
    return %c0_i32, %c0_i32_0 : i32, i32
  }
  func.func @transform_10(%arg0: i32, %arg1: i32, %arg2: i32, %arg3: memref<2xi32, #tpu.memory_space<smem>>) -> (i32, i32) {
    %c0_i32 = arith.constant 0 : i32
    %c0_i32_0 = arith.constant 0 : i32
    %c0_i32_1 = arith.constant 0 : i32
    return %c0_i32, %c0_i32_0 : i32, i32
  }
  func.func @transform_11(%arg0: i32, %arg1: i32, %arg2: i32, %arg3: memref<2xi32, #tpu.memory_space<smem>>) -> (i32, i32) {
    %c0_i32 = arith.constant 0 : i32
    %c0_i32_0 = arith.constant 0 : i32
    %c0_i32_1 = arith.constant 0 : i32
    return %c0_i32, %c0_i32_0 : i32, i32
  }
  func.func @transform_12(%arg0: i32, %arg1: i32, %arg2: i32, %arg3: memref<2xi32, #tpu.memory_space<smem>>) -> (i32, i32) {
    %c0_i32 = arith.constant 0 : i32
    %c0_i32_0 = arith.constant 0 : i32
    %c0_i32_1 = arith.constant 0 : i32
    return %c0_i32, %c0_i32_0 : i32, i32
  }
  func.func @transform_13(%arg0: i32, %arg1: i32, %arg2: i32, %arg3: memref<2xi32, #tpu.memory_space<smem>>) -> (i32, i32) {
    %c0_i32 = arith.constant 0 : i32
    %c0_i32_0 = arith.constant 0 : i32
    %c0_i32_1 = arith.constant 0 : i32
    return %c0_i32, %c0_i32_0 : i32, i32
  }
  func.func @transform_14(%arg0: i32, %arg1: i32, %arg2: i32, %arg3: memref<2xi32, #tpu.memory_space<smem>>) -> (i32, i32) {
    %c0_i32 = arith.constant 0 : i32
    %c0_i32_0 = arith.constant 0 : i32
    %c0_i32_1 = arith.constant 0 : i32
    return %c0_i32, %c0_i32_0 : i32, i32
  }
  func.func @transform_15(%arg0: i32, %arg1: i32, %arg2: i32, %arg3: memref<2xi32, #tpu.memory_space<smem>>) -> (i32, i32) {
    %c0_i32 = arith.constant 0 : i32
    %c0_i32_0 = arith.constant 0 : i32
    %c0_i32_1 = arith.constant 0 : i32
    return %c0_i32, %c0_i32_0 : i32, i32
  }
  func.func @transform_16(%arg0: i32, %arg1: i32, %arg2: i32, %arg3: memref<2xi32, #tpu.memory_space<smem>>) -> (i32, i32) {
    %c0_i32 = arith.constant 0 : i32
    %c0_i32_0 = arith.constant 0 : i32
    %c0_i32_1 = arith.constant 0 : i32
    return %c0_i32, %c0_i32_0 : i32, i32
  }
  func.func @transform_17(%arg0: i32, %arg1: i32, %arg2: i32, %arg3: memref<2xi32, #tpu.memory_space<smem>>) -> (i32, i32) {
    %c0_i32 = arith.constant 0 : i32
    %c0_i32_0 = arith.constant 0 : i32
    %c0_i32_1 = arith.constant 0 : i32
    return %c0_i32, %c0_i32_0 : i32, i32
  }
  func.func @transform_18(%arg0: i32, %arg1: i32, %arg2: i32, %arg3: memref<2xi32, #tpu.memory_space<smem>>) -> (i32, i32, i32) {
    %c0_i32 = arith.constant 0 : i32
    %c0_i32_0 = arith.constant 0 : i32
    return %arg0, %arg1, %c0_i32 : i32, i32, i32
  }
}

</mosaic_0001>

<bundles_post_ra>
// kernel: tpu_custom_call.1
= control target key start
LH: loop header
LB: loop body
LE: loop exit
PB: predicated region body
PF: predicated region fallthrough
CT: control target
= control target key end

     0   :  { %s2240_s0 = inlined_call_operand.vmem [shape: s32[2], index: 0, kind: input, shape index: {}]   ;;  %s2241_s1 = inlined_call_operand.vmem [shape: f32[2,8,32], index: 1, kind: input, shape index: {}]   ;;  %s2242_s2 = inlined_call_operand.vmem [shape: f32[2,8,32], index: 2, kind: input, shape index: {}]   ;;  %s2243_s3 = inlined_call_operand.vmem [shape: bf16[4,32,8], index: 3, kind: input, shape index: {}]   ;;  %s2244_s4 = inlined_call_operand.vmem [shape: f32[4,1,8], index: 4, kind: input, shape index: {}]   ;;  %s2245_s5 = inlined_call_operand.vmem [shape: bf16[4,32,8], index: 5, kind: input, shape index: {}]   ;;  %s2246_s6 = inlined_call_operand.vmem [shape: f32[4,1,8], index: 6, kind: input, shape index: {}]   ;;  %s2247_s7 = inlined_call_operand.vmem [shape: bf16[4,32,8], index: 7, kind: input, shape index: {}]   ;;  %s2248_s8 = inlined_call_operand.vmem [shape: f32[4,1,8], index: 8, kind: input, shape index: {}]   ;;  %s2249_s9 = inlined_call_operand.vmem [shape: bf16[4,8,32], index: 9, kind: input, shape index: {}]   ;;  %s2250_s10 = inlined_call_operand.vmem [shape: f32[1,32], index: 10, kind: input, shape index: {}]   ;;  %s2251_s11 = inlined_call_operand.vmem [shape: bf16[32,64], index: 11, kind: input, shape index: {}]   ;;  %s2252_s12 = inlined_call_operand.vmem [shape: f32[1,64], index: 12, kind: input, shape index: {}]   ;;  %s2253_s13 = inlined_call_operand.vmem [shape: bf16[64,32], index: 13, kind: input, shape index: {}]   ;;  %s2254_s14 = inlined_call_operand.vmem [shape: f32[1,32], index: 14, kind: input, shape index: {}]   ;;  %s2255_s15 = inlined_call_operand.vmem [shape: f32[1,32], index: 15, kind: input, shape index: {}]   ;;  %s2256_s16 = inlined_call_operand.vmem [shape: f32[1,32], index: 16, kind: input, shape index: {}]   ;;  %s2257_s17 = inlined_call_operand.vmem [shape: f32[1,32], index: 17, kind: input, shape index: {}]   ;;  %s2258_s18 = inlined_call_operand.vmem [shape: f32[1,32], index: 18, kind: input, shape index: {}]   ;;  %s2259_s19 = inlined_call_operand.hbm [shape: f32[2,8,32], index: 19, kind: output, shape index: {}]  }
   0x1   :  { %2273 = sst [smem:[#allocation20_spill]] %s2240_s0 }
   0x2   :  { %2274 = sst [smem:[#allocation21_spill]] %s2241_s1  ;;  %s2281_s20 = sld [smem:[#allocation20_spill]] }
   0x3   :  { %2275 = sst [smem:[#allocation22_spill]] %s2242_s2 }
   0x4   :  { %2276 = sst [smem:[#allocation23_spill]] %s2243_s3 }
   0x5   :  { %2277 = sst [smem:[#allocation24_spill]] %s2245_s5 }
   0x6   :  { %2278 = sst [smem:[#allocation25_spill]] %s2252_s12 }
   0x7   :  { %2279 = sst [smem:[#allocation26_spill]] %s2258_s18 }
   0x8   :  { %2280 = sst [smem:[#allocation27_spill]] %s2259_s19  ;;  %s24_s12 = sshll.u32 %s2281_s20, 4  ;;  %s25_s12 = int_to_ptr.vmem [resolvable:$true] %s24_s12 }
   0x9   :  { %s1761_s21 = scalar_lea.vmem %s25_s12, 16  ;;  %p1766_p1 = scmp.lt.s32.totalorder %s25_s12, %s25_s12 }
   0xa   :  { %p1762_p0 = scmp.ne.s32.totalorder %s25_s12, %s1761_s21  ;;  %p1767_p2 = scmp.lt.s32.totalorder %s1761_s21, %s1761_s21 }
   0xc   :  { %p1768_p3 = por %p1767_p2, %p1766_p1 }
   0xe   :  { %p1769_p4 = pnand %p1768_p3, %p1762_p0 }
  0x10   :  { %1772 = shalt.err (!%p1769_p4)  }
  0x11   :  { %s1871_s1 = smov [#allocation4]  }
  0x12   :  { %27 = dma.vmem_to_smem %s25_s12, 16, %s1871_s1, [#allocation3] }
  0x13   :  { %1833 = dma.done.wait [#allocation3], 16 }
  0x14   :  { %1834 = vsyncadd [#allocation3], 4294967280 }
  0x15   :  { %29 = sfence }
  0x16   :  { %30 = vsyncpa [#allocation6], 0 }
  0x17   :  { %32 = vsyncpa [#allocation6 + $0x1], 0  ;;  %s1981_s22 = smov 0   ;;  %s1983_s2 = smov 0  }
  0x18   :  { %s1985_s23 = smov 0   ;;  %s1987_s24 = smov 0  }
  0x19   :  { %s1989_s25 = smov 0   ;;  %s1991_s3 = smov 0  }
  0x1a   :  { %s1993_s26 = smov 0   ;;  %s1995_s12 = smov 0  }
  0x1b LB: > { %2282 = sst [smem:[#allocation9_spill]] %s1841_s22  ;;  %s1525_s27 = sadd.s32 4294967295, %s1869_s12   ;;  %s1869_s12 = sphi %s1995_s12, %s38_s12   ;;  %s1865_s26 = sphi %s1993_s26, %s2314_s26   ;;  %s1861_s3 = sphi %s1991_s3, %s2313_s3   ;;  %s1857_s25 = sphi %s1989_s25, %s2312_s25   ;;  %s1853_s24 = sphi %s1987_s24, %s2311_s24   ;;  %s1849_s23 = sphi %s1985_s23, %s2310_s23   ;;  %s1845_s2 = sphi %s1983_s2, %s2309_s2   ;;  %s1841_s22 = sphi %s1981_s22, %s2308_s22  }
  0x1c   : > { %2283 = sst [smem:[#allocation10_spill]] %s1845_s2  ;;  %s1526_s28 = sadd.s32 4294967294, %s1869_s12  }
  0x1d   : > { %2284 = sst [smem:[#allocation11_spill]] %s1849_s23  ;;  %s50_s29 = sadd.s32 1, %s1861_s3 }
  0x1e   : > { %2285 = sst [smem:[#allocation12_spill]] %s1861_s3  ;;  %p51_p5 = scmp.ge.s32.totalorder %s50_s29, 4 }
  0x1f   : > { %2286 = sst [smem:[#allocation13_spill]] %s1865_s26  ;;  %s57_s0 = sadd.s32 1, %s1865_s26 }
  0x20   : > { %2287 = sst [smem:[#allocation14_spill]] %s1869_s12  ;;  %p501_p6 = scmp.ne.s32.totalorder %s1849_s23, %s1845_s2 }
  0x21   : > { %p502_p7 = scmp.eq.s32.totalorder %s1525_s27, 7  ;;  %s2316_s29 = smov (%p51_p5, %s50_s29), 0 }
  0x22   : > { %2288 = sst [smem:[#allocation15_spill]] %s2316_s29  ;;  %s2318_s0 = smov (!%p51_p5, %s57_s0), %s1865_s26 }
  0x23   : > { %p2030_p8 = por %p502_p7, %p501_p6  ;;  %p507_p9 = scmp.ne.s32.totalorder %s1845_s2, %s1841_s22 }
  0x24   : > { %p59_p10 = scmp.ge.s32.totalorder %s2318_s0, 2  ;;  %p508_p11 = scmp.eq.s32.totalorder %s1526_s28, 7 }
  0x25   : > { %s2289_s30 = scalar_select %p2030_p8, 1, 0 }
  0x26   : > { %p1529_p12 = scmp.ge.s32.totalorder %s1869_s12, 1  ;;  %p619_p13 = scmp.lt.s32.totalorder %s1869_s12, 9 }
  0x27   : > { %2290 = sst [smem:[#allocation16_spill]] %s2289_s30  ;;  %s2320_s0 = smov (%p59_p10, %s2318_s0), 0 }
  0x28   : > { %2291 = sst [smem:[#allocation17_spill]] %s2320_s0  ;;  %p2040_p0 = por %p508_p11, %p507_p9 }
  0x29   : > { %p620_p1 = pnand %p1529_p12, %p619_p13  ;;  %s486_s21 = ssub.s32 %s1865_s26, %s2320_s0 }
  0x2a   : > { %s2292_s20 = scalar_select %p2040_p0, 1, 0 }
  0x2b   : > { %s491_s1 = sadd.s32 1, %s1849_s23  ;;  %p489_p2 = scmp.eq.s32.totalorder %s486_s21, 0  ;;  %v1872_v0 = vmov (!%p620_p1), 0.0   ;;  %vm1873_vm0 = vmmov (!%p620_p1), 0   ;;  %vm774_vm1 = vcmask (!%p620_p1), 261120   ;;  %vm950_vm2 = vcmask (!%p620_p1), 64512  }
  0x2c   : > { %2293 = sst [smem:[#allocation18_spill]] %s2292_s20  ;;  %623 = sbr.rel (%p620_p1) target bundleno = 2348 (0x92c), region = 92  ;;  %1610 = vmatprep.subr.bf16.mxu1 (!%p620_p1), %v1872_v0  ;;  %1602 = vmatprep.subr.bf16.mxu0 (!%p620_p1), %v1872_v0  ;;  %v997_v27 = vlaneseq (!%p620_p1)  ;;  %vm1019_vm4 = vcmask (!%p620_p1), 1043456  }
  0x2d   : > { %s2048_s27 = scalar_select %p489_p2, %s1849_s23, %s491_s1  }
  0x2e   : > { %p718_p3 = scmp.lt.s32.totalorder (!%p620_p1), %s1853_s24, 3  ;;  %s2263_s28 = sand.u32 (!%p620_p1), 1, %s1845_s2   ;;  %1614 = vmatprep.mubr.msk.bf16.mxu1 (!%p620_p1), %vm1873_vm0, %v1872_v0  ;;  %1606 = vmatprep.mubr.msk.bf16.mxu0 (!%p620_p1), %vm1873_vm0, %v1872_v0  ;;  %v998_v28 = vand.u32 (!%p620_p1), 127, %v997_v27 }
  0x2f   : > { %2294 = sst [smem:[#allocation19_spill]] %s2048_s27  ;;  %s2055_s29 = sshll.u32 (!%p620_p1), %s2263_s28, 3 }
  0x30   : > { %p707_p4 = scmp.lt.s32.totalorder (!%p620_p1), %s1857_s25, 1  ;;  %s2295_s5 = sld [smem:[#allocation24_spill]] (!%p620_p1) }
  0x31   : > { %s2296_s23 = sld [smem:[#allocation23_spill]] (!%p620_p1)  ;;  %s2297_s27 = sld [smem:[#allocation22_spill]] (!%p620_p1) }
  0x32   : > { %p1555_p5 = scmp.ne.s32.totalorder (!%p620_p1), %s1853_s24, 0 }
  0x33   : > { %s2059_s21 = scalar_select %p718_p3, %s1853_s24, 3 }
  0x34   : > { %s708_s22 = scalar_select %p707_p4, %s1857_s25, 1 }
  0x35   : > { %s1576_s1 = sshll.u32 %s2059_s21, 4  ;;  %s733_s19 = scalar_lea.vmem %s2246_s6, %s2059_s21 }
  0x36   : > { %s730_s3 = scalar_lea.vmem %s2295_s5, %s1576_s1  ;;  %s2077_s30 = scalar_lea.vmem %s2247_s7, %s1576_s1  ;;  %v1544_v9 = vld [vmem:[%s733_s19] ss:$0 sm:$0xff] }
  0x37   : > { %v1741_v1 = vld [vmem:[%s730_s3] sm:$0xff]   ;;  %s722_s20 = scalar_lea.vmem %s2296_s23, %s1576_s1  ;;  %v1743_v3 = vld [vmem:[%s730_s3 + $0x8] sm:$0xff]   ;;  %s1531_s2 = sshll.u32 %s708_s22, 3 }
  0x38   : > { %v1742_v2 = vld [vmem:[%s722_s20] sm:$0xff]   ;;  %1611 = vmatpush3.bf16.msra.mxu1 %v1741_v1  ;;  %v1744_v4 = vld [vmem:[%s722_s20 + $0x8] sm:$0xff]   ;;  %s717_s23 = scalar_lea.vmem %s2297_s27, %s1531_s2  ;;  %s2298_s3 = sld [smem:[#allocation21_spill]] }
  0x39   : > { %1612 = vmatprep.subr.bf16.mxu1 %v1872_v0  ;;  %1603 = vmatpush3.bf16.msra.mxu0 %v1742_v2  ;;  %v749_v5 = vld [vmem:[%s717_s23] sm:$0xff]  ;;  %s725_s12 = scalar_lea.vmem %s2244_s4, %s2059_s21  ;;  %v1746_v26 = vld [vmem:[%s2077_s30 + $0x8] sm:$0xff]   ;;  %s999_s20 = sld [smem:[#allocation4 + %s1857_s25]] }
  0x3a   : > { %1604 = vmatprep.subr.bf16.mxu0 %v1872_v0  ;;  %v750_v7 = vpack.c.bf16 %v749_v5, %v749_v5  ;;  %v1540_v10 = vld [vmem:[%s725_s12] ss:$0 sm:$0xff]  ;;  %s741_s26 = scalar_lea.vmem %s2248_s8, %s2059_s21  ;;  %s1539_s0 = sshll.u32 %s2059_s21, 2 }
  0x3b   : > { %v1745_v25 = vld [vmem:[%s2077_s30] sm:$0xff]   ;;  %s745_s28 = scalar_lea.vmem %s2249_s9, %s1539_s0  ;;  %s706_s21 = scalar_lea.vmem [#allocation5], %s2055_s29 }
  0x3c   : > { %1613 = vmatpush3.bf16.msra.mxu1 %v1743_v3  ;;  %v1548_v44 = vld [vmem:[%s741_s26] ss:$0 sm:$0xff] }
  0x3d   : > { %1605 = vmatpush3.bf16.msra.mxu0 %v1744_v4  ;;  %1626 = vmatprep.subr.bf16.mxu1 %v1872_v0  ;;  %v1064_v49 = vld [vmem:[%s745_s28] sm:$0xf] }
  0x3e   : > { %s713_s18 = scalar_lea.vmem %s2298_s3, %s1531_s2  ;;  %1618 = vmatprep.subr.bf16.mxu0 %v1872_v0  ;;  %v1069_v50 = vsel %vm1019_vm4, %v1064_v49, 0 }
  0x3f   : > { %v2087_v6 = vld [vmem:[%s713_s18] sm:$0xff]  ;;  %1615 = vmatmul.mubr.msk.bf16.vlgmr.msra.gmra.mrb[0].mxu1 %vm774_vm1, %v750_v7  ;;  %v1000_v29 = vstv %s999_s20 }
  0x40   : > { %v748_v8 = vpack.c.bf16 %v2087_v6, %v2087_v6  ;;  %1628 = vmatprep.mubr.msk.bf16.mxu1 %vm1873_vm0, %v1872_v0  ;;  %vm1001_vm3 = vcmp.lt.s32.totalorder %v998_v28, %v1000_v29 }
  0x42   : > { %1607 = vmatmul.mubr.msk.bf16.vlgmr.msra.gmra.mrb[0].mxu0 %vm774_vm1, %v748_v8 }
  0x43   : > { %1622 = vmatprep.mubr.msk.bf16.mxu0 %vm1873_vm0, %v1872_v0  ;;  %1619 = vmatpush3.bf16.msra.mxu0 %v1745_v25 }
  0x44   : > { %1620 = vmatprep.subr.bf16.mxu0 %v1872_v0 }
  0x47   : > { %1621 = vmatpush3.bf16.msra.mxu0 %v1746_v26 }
  0x48   : > { %1632 = vmatprep.subr.bf16.mxu0 %v1872_v0 }
  0x4a   : > { %1623 = vmatmul.mubr.msk.bf16.vlgmr.msra.gmra.mrb[4].mxu0 %vm774_vm1, %v750_v7 }
  0x4b   : > { %1634 = vmatprep.mubr.msk.bf16.mxu0 %vm1873_vm0, %v1872_v0 }
 0x112   : > { %v878_v11 = vpop.f32.mrb[0].mxu1 }
 0x113   : > { %v879_v12 = vadd.f32 %v1544_v9, %v878_v11  ;;  %v1616_v13 = vpop.f32.mrb[1].mxu1 }
 0x114   : > { %v881_v15 = vpop.f32.mrb[2].mxu1 }
 0x115   : > { %v812_v14 = vpop.f32.mrb[0].mxu0  ;;  %v949_v18 = vpack.c.bf16 %v879_v12, %v879_v12  ;;  %v1617_v19 = vpop.f32.mrb[3].mxu1 }
 0x116   : > { %v813_v16 = vadd.f32 %v1540_v10, %v812_v14  ;;  %v1608_v17 = vpop.f32.mrb[1].mxu0 }
 0x117   : > { %v815_v20 = vpop.f32.mrb[2].mxu0  ;;  %v955_v22 = vsel %vm950_vm2, %v949_v18, 0 }
 0x118   : > { %v1609_v21 = vpop.f32.mrb[3].mxu0  ;;  %v947_v23 = vmul.f32 0.35355338, %v813_v16  ;;  %1627 = vmatpush3.bf16.xpose.msra.mxu1 %v955_v22 }
 0x119   : > { %1638 = vmatprep.subr.bf16.mxu1 %v1872_v0 }
 0x11a   : > { %v948_v24 = vpack.c.bf16 %v947_v23, %v947_v23 }
 0x11d   : > { %v941_v41 = vpop.f32.mrb[4].mxu0 }
 0x11e   : > { %v1624_v42 = vpop.f32.mrb[5].mxu0  ;;  %v942_v46 = vadd.f32 %v1548_v44, %v941_v41 }
 0x11f   : > { %1629 = vmatmul.mubr.msk.bf16.vlgmr.msra.gmra.mrb[4].mxu1 %vm950_vm2, %v948_v24  ;;  %v944_v43 = vpop.f32.mrb[6].mxu0 }
 0x120   : > { %1640 = vmatprep.mubr.msk.bf16.mxu1 %vm1873_vm0, %v1872_v0  ;;  %v1625_v45 = vpop.f32.mrb[7].mxu0  ;;  %v1015_v47 = vpack.c.bf16 %v942_v46, %v942_v46  ;;  %1639 = vmatpush3.bf16.msra.mxu1 %v1069_v50  ;;  %v1874_v0 = vmov (!%p1555_p5), 0.0  }
 0x121   : > { %1115 = vst.msk [vmem:[#allocation2] sm:$0xff] (!%p1555_p5), %vm774_vm1, %v1874_v0 }
 0x122   : > { %v1021_v48 = vsel %vm1019_vm4, %v1015_v47, 0 }
 0x123   : > { %1633 = vmatpush3.bf16.msra.mxu0 %v1021_v48 }
 0x1f2   : > { %v991_v30 = vpop.f32.mrb[4].mxu1 }
 0x1f3   : > { %v1002_v31 = vsel %vm1001_vm3, %v991_v30, -1e+09  ;;  %v1630_v32 = vpop.f32.mrb[5].mxu1 }
 0x1f4   : > { %v994_v33 = vpop.f32.mrb[6].mxu1  ;;  %v1003_v34 = vsel %vm950_vm2, %v1002_v31, -inf }
 0x1f5   : > { %1004 = vmax.xlane.f32.xlu0 %v1003_v34  ;;  %v1631_v35 = vpop.f32.mrb[7].mxu1 }
 0x282   : > { %v1005_v36 = vpop.xlane.xlu0 %1004 }
 0x283   : > { %v1006_v37 = vsub.f32 %v1002_v31, %v1005_v36 }
 0x285   : > { %v1007_v38 = vmul.f32 1.442695, %v1006_v37 }
 0x287   : > { %1747 = vpow2.f32 %v1007_v38 }
 0x291   : > { %v1748_v39 = vpop.eup %1747 }
 0x292   : > { %v1009_v40 = vsel %vm950_vm2, %v1748_v39, 0.0 }
 0x293   : > { %1010 = vadd.xlane.f32.xlu0 %v1009_v40 }
 0x320   : > { %v1011_v51 = vpop.xlane.xlu0 %1010 }
 0x321   : > { %1749 = vrcp.f32 %v1011_v51 }
 0x32b   : > { %v1750_v52 = vpop.eup %1749 }
 0x32c   : > { %v1013_v53 = vmul.f32 %v1750_v52, %v1748_v39 }
 0x32e   : > { %v1014_v54 = vpack.c.bf16 %v1013_v53, %v1013_v53 }
 0x330   : > { %1635 = vmatmul.mubr.msk.bf16.vlgmr.msra.gmra.mrb[8].mxu0 %vm950_vm2, %v1014_v54 }
 0x403   : > { %v1057_v55 = vpop.f32.mrb[8].mxu0 }
 0x404   : > { %v1063_v56 = vpack.c.bf16 %v1057_v55, %v1057_v55  ;;  %v1636_v57 = vpop.f32.mrb[9].mxu0 }
 0x405   : > { %v1060_v58 = vpop.f32.mrb[10].mxu0 }
 0x406   : > { %v1637_v59 = vpop.f32.mrb[11].mxu0  ;;  %1641 = vmatmul.mubr.msk.bf16.vlgmr.msra.gmra.mrb[8].mxu1 %vm950_vm2, %v1063_v56 }
 0x4d6   : > { %1114 = sbr.rel (%p1555_p5) target bundleno = 1245 (0x4dd), region = 96 }
 0x4d9   : > { %v1105_v60 = vpop.f32.mrb[8].mxu1 }
 0x4da   : > { %v1642_v61 = vpop.f32.mrb[9].mxu1 }
 0x4db   : > { %v1108_v62 = vpop.f32.mrb[10].mxu1 }
 0x4dc   : > { %v1643_v63 = vpop.f32.mrb[11].mxu1 }
 0x4dd PF: > { %v1116_v1 = vld [vmem:[#allocation2] sm:$0xff]  ;;  %p1556_p6 = scmp.ne.s32.totalorder %s1853_s24, 3 }
 0x4de   : > { %v1117_v2 = vadd.f32 %v1116_v1, %v1105_v60  ;;  %v1557_v4 = vld [vmem:[%s2250_s10] ss:$0 sm:$0xff] (!%p1556_p6)  ;;  %v1875_v15 = vmov (!%p1556_p6), 0.0   ;;  %vm1876_vm5 = vmmov (!%p1556_p6), 0   ;;  %v1754_v17 = vld [vmem:[%s2253_s13 + $0x8] sm:$0xff] (!%p1556_p6)   ;;  %v1755_v28 = vld [vmem:[%s2253_s13 + $0x10] sm:$0xff] (!%p1556_p6)  }
 0x4df   : > { %1122 = sbr.rel (%p1556_p6) target bundleno = 2323 (0x913), region = 100  ;;  %v1751_v14 = vld [vmem:[%s2251_s11] sm:$0xff] (!%p1556_p6)   ;;  %1644 = vmatprep.subr.bf16.mxu0 (!%p1556_p6), %v1875_v15  ;;  %1648 = vmatprep.mubr.msk.bf16.mxu0 (!%p1556_p6), %vm1876_vm5, %v1875_v15  ;;  %v1756_v29 = vld [vmem:[%s2253_s13 + $0x18] sm:$0xff] (!%p1556_p6)   ;;  %s2299_s19 = sld [smem:[#allocation25_spill]] (!%p1556_p6)  ;;  %vm1271_vm6 = vcmask (!%p1556_p6), 523264  }
 0x4e0   : > { %1118 = vst.msk [vmem:[#allocation2] sm:$0xff] %vm774_vm1, %v1117_v2  ;;  %1645 = vmatpush3.bf16.msra.mxu0 (!%p1556_p6), %v1751_v14  ;;  %1652 = vmatprep.subr.bf16.mxu1 (!%p1556_p6), %v1875_v15  ;;  %v1753_v16 = vld [vmem:[%s2253_s13] sm:$0xff] (!%p1556_p6)   ;;  %s2300_s26 = sld [smem:[#allocation26_spill]] (!%p1556_p6) }
 0x4e1   : > { %1646 = vmatprep.subr.bf16.mxu0 (!%p1556_p6), %v1875_v15  ;;  %1660 = vmatprep.mubr.msk.bf16.mxu1 (!%p1556_p6), %vm1876_vm5, %v1875_v15  ;;  %v1558_v22 = vld [vmem:[%s2255_s15] ss:$0 sm:$0xff] (!%p1556_p6) }
 0x4e2   : > { %1653 = vmatpush3.bf16.msra.mxu1 (!%p1556_p6), %v1753_v16  ;;  %v1559_v24 = vld [vmem:[%s2256_s16] ss:$0 sm:$0xff] (!%p1556_p6) }
 0x4e3   : > { %1654 = vmatprep.subr.bf16.mxu1 (!%p1556_p6), %v1875_v15  ;;  %v1564_v38 = vld [vmem:[%s2254_s14] ss:$0 sm:$0xff] (!%p1556_p6) }
 0x4e4   : > { %v1570_v55 = vld [vmem:[%s2257_s17] ss:$0 sm:$0xff] (!%p1556_p6) }
 0x4e5   : > { %v1560_v30 = vld [vmem:[%s2299_s19] ss:$0 sm:$0xff] (!%p1556_p6) }
 0x4e6   : > { %1655 = vmatpush3.bf16.msra.mxu1 %v1754_v17  ;;  %v1571_v57 = vld [vmem:[%s2300_s26] ss:$0 sm:$0xff] }
 0x4e7   : > { %v1123_v3 = vld [vmem:[#allocation2] sm:$0xff]  ;;  %1656 = vmatprep.subr.bf16.mxu1 %v1875_v15 }
 0x4e8   : > { %v1131_v5 = vadd.f32 %v1557_v4, %v1123_v3 }
 0x4ea   : > { %v1132_v7 = vadd.f32 %v1131_v5, %v2087_v6  ;;  %v1752_v6 = vld [vmem:[%s2251_s11 + $0x8] sm:$0xff]   ;;  %1657 = vmatpush3.bf16.msra.mxu1 %v1755_v28 }
 0x4eb   : > { %1647 = vmatpush3.bf16.msra.mxu0 %v1752_v6  ;;  %1658 = vmatprep.subr.bf16.mxu1 %v1875_v15 }
 0x4ec   : > { %v1135_v8 = vsel %vm774_vm1, %v1132_v7, 0.0 }
 0x4ed   : > { %1136 = vadd.xlane.f32.xlu0 %v1135_v8 }
 0x4ee   : > { %1659 = vmatpush3.bf16.msra.mxu1 %v1756_v29 }
 0x57a   : > { %v1137_v9 = vpop.xlane.xlu0 %1136 }
 0x57b   : > { %v1139_v10 = vmul.f32 0.03125, %v1137_v9 }
 0x57d   : > { %v1140_v11 = vsub.f32 %v1132_v7, %v1139_v10 }
 0x57f   : > { %v1141_v12 = vmul.f32 %v1140_v11, %v1140_v11 }
 0x581   : > { %v1142_v13 = vsel %vm774_vm1, %v1141_v12, 0.0 }
 0x582   : > { %1143 = vadd.xlane.f32.xlu0 %v1142_v13 }
 0x60f   : > { %v1144_v18 = vpop.xlane.xlu0 %1143 }
 0x610   : > { %v1145_v19 = vmul.f32 0.03125, %v1144_v18 }
 0x612   : > { %v1146_v20 = vadd.f32 1e-05, %v1145_v19 }
 0x614   : > { %1757 = vrsqrt.f32 %v1146_v20 }
 0x61e   : > { %v1758_v21 = vpop.eup %1757 }
 0x61f   : > { %v1148_v23 = vmul.f32 %v1758_v21, %v1140_v11 }
 0x621   : > { %v1155_v25 = vmul.f32 %v1558_v22, %v1148_v23 }
 0x623   : > { %v1162_v26 = vadd.f32 %v1559_v24, %v1155_v25 }
 0x625   : > { %v1163_v27 = vpack.c.bf16 %v1162_v26, %v1162_v26 }
 0x627   : > { %1649 = vmatmul.mubr.msk.bf16.vlgmr.msra.gmra.mrb[0].mxu0 %vm774_vm1, %v1163_v27 }
 0x6fa   : > { %v1224_v31 = vpop.f32.mrb[0].mxu0 }
 0x6fb   : > { %v1225_v32 = vadd.f32 %v1560_v30, %v1224_v31  ;;  %v1650_v33 = vpop.f32.mrb[1].mxu0 }
 0x6fc   : > { %v1227_v34 = vpop.f32.mrb[2].mxu0 }
 0x6fd   : > { %v1230_v35 = vmax.f32 %v1225_v32, 0.0  ;;  %v1651_v36 = vpop.f32.mrb[3].mxu0 }
 0x6ff   : > { %v1231_v37 = vpack.c.bf16 %v1230_v35, %v1230_v35 }
 0x701   : > { %1661 = vmatmul.mubr.msk.bf16.vlgmr.msra.gmra.mrb[0].mxu1 %vm1271_vm6, %v1231_v37 }
 0x7d4   : > { %v1309_v39 = vpop.f32.mrb[0].mxu1 }
 0x7d5   : > { %v1310_v40 = vadd.f32 %v1564_v38, %v1309_v39  ;;  %v1662_v41 = vpop.f32.mrb[1].mxu1 }
 0x7d6   : > { %v1312_v42 = vpop.f32.mrb[2].mxu1 }
 0x7d7   : > { %v1663_v43 = vpop.f32.mrb[3].mxu1  ;;  %v1315_v44 = vadd.f32 %v1310_v40, %v1162_v26 }
 0x7d9   : > { %v1318_v45 = vsel %vm774_vm1, %v1315_v44, 0.0 }
 0x7da   : > { %1319 = vadd.xlane.f32.xlu1 %v1318_v45 }
 0x867   : > { %v1320_v46 = vpop.xlane.xlu1 %1319 }
 0x868   : > { %v1321_v47 = vmul.f32 0.03125, %v1320_v46 }
 0x86a   : > { %v1322_v48 = vsub.f32 %v1315_v44, %v1321_v47 }
 0x86c   : > { %v1323_v49 = vmul.f32 %v1322_v48, %v1322_v48 }
 0x86e   : > { %v1324_v50 = vsel %vm774_vm1, %v1323_v49, 0.0 }
 0x86f   : > { %1325 = vadd.xlane.f32.xlu1 %v1324_v50 }
 0x8fc   : > { %v1326_v51 = vpop.xlane.xlu1 %1325 }
 0x8fd   : > { %v1327_v52 = vmul.f32 0.03125, %v1326_v51 }
 0x8ff   : > { %v1328_v53 = vadd.f32 1e-05, %v1327_v52 }
 0x901   : > { %1759 = vrsqrt.f32 %v1328_v53 }
 0x90b   : > { %v1760_v54 = vpop.eup %1759 }
 0x90c   : > { %v1330_v56 = vmul.f32 %v1760_v54, %v1322_v48 }
 0x90e   : > { %v1337_v58 = vmul.f32 %v1570_v55, %v1330_v56 }
 0x910   : > { %v1344_v59 = vadd.f32 %v1571_v57, %v1337_v58 }
 0x912   : > { %1345 = vst.msk [vmem:[%s706_s21] sm:$0xff] %vm774_vm1, %v1344_v59 }
 0x913 PF: > { %s2301_s0 = sld [smem:[#allocation10_spill]]  ;;  %s1573_s23 = sshll.u32 %s1857_s25, 7 }
 0x914   : > { %s2303_s5 = sld [smem:[#allocation27_spill]]  ;;  %s1361_s18 = sshll.u32 %s706_s21, 4  ;;  %s1362_s18 = int_to_ptr.vmem [resolvable:$true] %s1361_s18 }
 0x915   : > { %s1773_s2 = scalar_lea.vmem %s1362_s18, 128  ;;  %s1877_s12 = smov [#allocation5]  }
 0x916   : > { %p1774_p7 = scmp.ne.s32.totalorder %s1362_s18, %s1773_s2  ;;  %s1777_s20 = sshll.u32 %s1877_s12, 4  ;;  %s1778_s20 = int_to_ptr.vmem [resolvable:$false] %s1777_s20 }
 0x917   : > { %s1779_s30 = scalar_lea.vmem %s1778_s20, 256  ;;  %p1780_p11 = scmp.lt.s32.totalorder %s1362_s18, %s1778_s20 }
 0x918   : > { %p1775_p9 = pnand %p1774_p7, %p2030_p8  ;;  %p1781_p12 = scmp.lt.s32.totalorder %s1779_s30, %s1773_s2 }
 0x919   : > { %s2304_s19 = sand.u32 1, %s2301_s0  }
 0x91a   : > { %s2189_s24 = scalar_lea.hbm %s2303_s5, %s1573_s23  ;;  %s1347_s22 = scalar_lea.sflag [#allocation6], %s2304_s19 }
 0x91b   : > { %p1776_p10 = pneg %p1775_p9  ;;  %p1782_p13 = por %p1781_p12, %p1780_p11 }
 0x91d   : > { %p1783_p1 = pnand %p1782_p13, %p1776_p10 }
 0x91f   : > { %1786 = shalt.err (!%p1783_p1)
}
 0x920   : > { %s1787_s25 = scalar_lea.hbm %s2189_s24, 128  ;;  %s1791_s1 = scalar_lea.hbm %s2303_s5, 256 }
 0x921   : > { %p1788_p2 = scmp.ne.s32.totalorder %s2189_s24, %s1787_s25  ;;  %p1792_p5 = scmp.lt.u32.totalorder %s2189_s24, %s2303_s5 }
 0x922   : > { %p1793_p6 = scmp.lt.u32.totalorder %s1791_s1, %s1787_s25  ;;  %p1795_p9 = scmp.lt.u32.totalorder %s1787_s25, %s2189_s24 }
 0x923   : > { %p1789_p3 = pnand %p1788_p2, %p2030_p8 }
 0x924   : > { %p1794_p7 = por %p1793_p6, %p1792_p5 }
 0x925   : > { %p1790_p4 = pneg %p1789_p3 }
 0x926   : > { %p1796_p10 = por %p1795_p9, %p1794_p7 }
 0x928   : > { %p1797_p11 = pnand %p1796_p10, %p1790_p4 }
 0x92a   : > { %1800 = shalt.err (!%p1797_p11)
}
 0x92b   : > { %1664 = dma.vmem_to_hbm [thread:$0]  (%p2030_p8), %s1362_s18, 128, %s2189_s24, %s1347_s22  }
 0x92c PF: > { %s2305_s23 = sld [smem:[#allocation14_spill]]  ;;  %s2306_s28 = sld [smem:[#allocation9_spill]] }
 0x932   : > { %p1670_p12 = scmp.ge.s32.totalorder %s2305_s23, 2  ;;  %s1373_s19 = sand.u32 1, %s2306_s28  }
 0x933   : > { %s1374_s2 = scalar_lea.sflag [#allocation6], %s1373_s19 }
 0x934   : > { %p1667_p13 = pnand %p1670_p12, %p2040_p0 }
 0x936   : > { %1836 = dma.done.wait (!%p1667_p13), %s1374_s2, 128  }
 0x937   : > { %1838 = vsyncadd (!%p1667_p13), %s1374_s2, 4294967168  ;;  %s38_s12 = sadd.s32 1, %s2305_s23   ;;  %s2308_s22 = sld [smem:[#allocation10_spill]] }
 0x938   : > { %p35_p1 = scmp.ge.s32.totalorder %s38_s12, 10   ;;  %s2309_s2 = sld [smem:[#allocation11_spill]] }
 0x939   : > { %s2310_s23 = sld [smem:[#allocation19_spill]]  ;;  %s2311_s24 = sld [smem:[#allocation12_spill]] }
 0x93a   : > { %s2312_s25 = sld [smem:[#allocation13_spill]]  ;;  %s2313_s3 = sld [smem:[#allocation15_spill]] }
 0x93b   : > { %s2314_s26 = sld [smem:[#allocation17_spill]]  ;;  %37 = sbr.rel (!%p35_p1) target bundleno = 27 (0x1b), region = 159 }
 0x942   :  { %1379 = vsyncpa [#allocation6], 1 }
 0x943   :  { %1381 = vsyncpa [#allocation6 + $0x1], 1 }

</bundles_post_ra>
